<compile_context>
chip_gen: v6e
topology: v6e:2x2x1
jax: 0.10.0
libtpu: 0.0.40
codegen_flags: <defaults>
</compile_context>

<pallas_src>
import jax
import jax.numpy as jnp
from jax.experimental import pallas as pl
from jax.experimental.pallas import tpu as pltpu


def _round_up(x, m):
    return ((x + m - 1) // m) * m


def _vmem_budget():
    """Generation-aware budget for the double-buffered blocks + scoped limit."""
    try:
        phys = int(pltpu.get_tpu_info().vmem_capacity_bytes)
    except Exception:
        phys = 64 * 1024 * 1024          # conservative (v7x per-TC physical)
    budget = min(48 << 20, phys // 2)    # v5e/v6e: 48 MiB, v7x: 32 MiB
    limit = min((phys * 3) // 4, budget + (8 << 20))
    return budget, limit


# ----------------------------------------------------------------------------
# Kernel 1: row softmax over dim=1  (classification, robust=False path)
# ----------------------------------------------------------------------------
def _softmax_kernel(x_ref, o_ref):
    # Single load per tile, f32 compute, EUP reciprocal instead of divide.
    x = x_ref[...].astype(jnp.float32)                   # [tile_b, C]
    m = jnp.max(x, axis=-1, keepdims=True)
    e = jnp.exp(x - m)
    s = jnp.sum(e, axis=-1, keepdims=True)
    o_ref[...] = (e * pl.reciprocal(s, approx=True)).astype(o_ref.dtype)


def softmax_dim1(output, tile_b=None):
    """Equivalent of torch.nn.functional.softmax(output, dim=1).

    No padding / slicing passes: the class dim uses the full array extent
    (always layout-legal), the batch dim is tiled with grid = cdiv(B, tile_b)
    and the ragged last tile relies on Pallas dropping out-of-bounds stores.
    """
    B, C = output.shape
    dtype = output.dtype
    itemsize = jnp.dtype(dtype).itemsize

    budget, vmem_limit = _vmem_budget()
    # 2 input + 2 output double-buffered blocks of (tile_b, C) in input dtype.
    max_rows = max(8, (budget // (4 * C * itemsize)) // 8 * 8)
    if tile_b is None:
        tile_b = max_rows
    tile_b = int(min(int(tile_b), max_rows))
    if B <= tile_b:
        tile_b = B                       # full batch dim -> always legal block
    else:
        tile_b = max(8, (tile_b // 8) * 8)
    grid = int(pl.cdiv(B, tile_b))

    return pl.pallas_call(
        _softmax_kernel,
        out_shape=jax.ShapeDtypeStruct((B, C), dtype),
        grid=(grid,),
        in_specs=[pl.BlockSpec((tile_b, C), lambda i: (i, 0))],
        out_specs=pl.BlockSpec((tile_b, C), lambda i: (i, 0)),
        compiler_params=pltpu.CompilerParams(
            dimension_semantics=("parallel",),
            vmem_limit_bytes=vmem_limit),
    )(output)


# ----------------------------------------------------------------------------
# Kernel 2: robust-regression evaluation path
#   inputs (wrapper lays them out as (R, 128) f32, lane+sublane dense):
#     mean, log_std  (= output.chunk(2, dim=1)), target
#   scalar prefetch: norm_params = (mean, std), count = B
#   per tile:
#     pred   = mean * norm_std + norm_mean             (normalizer.denorm)
#     std_al = norm_std * exp(log_std)
#     ae     = |tgt - pred|
#   per-lane VMEM accumulators (pure VPU adds per step):
#     sum(ae), sum(ae^2) [== sum((pred-tgt)^2)], sum(std_al),
#     sum(|std_al-ae|), sum(std_al*ae), sum(std_al^2)
#   finalized once at the last grid step into metrics[5]:
#     [mae, rmse, std_al_mean, mae_std_al_ae, pearson(std_al, ae)]
# ----------------------------------------------------------------------------
def _robust_reg_kernel(norm_ref, cnt_ref, mean_ref, logstd_ref, tgt_ref,
                       pred_ref, std_ref, met_ref, acc_ref):
    i = pl.program_id(0)
    last = pl.num_programs(0) - 1
    tile_r, lanes = mean_ref.shape

    n_mean = norm_ref[0]
    n_std = norm_ref[1]
    n_valid = cnt_ref[0]

    @pl.when(i == 0)
    def _init():
        acc_ref[...] = jnp.zeros_like(acc_ref)

    mean = mean_ref[...].astype(jnp.float32)              # [tile_r, 128]
    log_std = logstd_ref[...].astype(jnp.float32)
    tgt = tgt_ref[...].astype(jnp.float32)

    pred = mean * n_std + n_mean                           # denorm
    std_al = n_std * jnp.exp(log_std)
    ae = jnp.abs(tgt - pred)

    pred_ref[...] = pred
    std_ref[...] = std_al

    # Validity mask (flat index < B).  jnp.where (select) so that garbage in
    # padded / out-of-bounds rows (possibly NaN/inf) cannot poison the sums.
    row = jax.lax.broadcasted_iota(jnp.int32, (tile_r, lanes), 0)
    lane = jax.lax.broadcasted_iota(jnp.int32, (tile_r, lanes), 1)
    flat = (i * tile_r + row) * lanes + lane
    valid = flat < n_valid

    ae_m = jnp.where(valid, ae, 0.0)
    std_m = jnp.where(valid, std_al, 0.0)
    absdiff_m = jnp.where(valid, jnp.abs(std_al - ae), 0.0)

    # Pure elementwise per-lane accumulation (no cross-lane reduce per step).
    acc_ref[0] += ae_m
    acc_ref[1] += ae_m * ae_m              # == (pred - tgt)^2, masked
    acc_ref[2] += std_m
    acc_ref[3] += absdiff_m
    acc_ref[4] += std_m * ae_m
    acc_ref[5] += std_m * std_m

    @pl.when(i == last)
    def _finalize():
        bcount = n_valid.astype(jnp.float32)
        inv_b = 1.0 / bcount
        s_ae = jnp.sum(acc_ref[0])
        s_ae2 = jnp.sum(acc_ref[1])
        s_std = jnp.sum(acc_ref[2])
        s_absdiff = jnp.sum(acc_ref[3])
        s_std_ae = jnp.sum(acc_ref[4])
        s_std2 = jnp.sum(acc_ref[5])

        mae = s_ae * inv_b
        rmse = jnp.sqrt(s_ae2 * inv_b)
        std_al_mean = s_std * inv_b
        mae_std_al_ae = s_absdiff * inv_b
        cov = s_std_ae - bcount * std_al_mean * mae
        var_x = jnp.maximum(s_std2 - bcount * std_al_mean * std_al_mean, 0.0)
        var_y = jnp.maximum(s_ae2 - bcount * mae * mae, 0.0)
        pearson = cov / (jnp.sqrt(var_x) * jnp.sqrt(var_y) + 1e-12)
        met_ref[0] = mae
        met_ref[1] = rmse
        met_ref[2] = std_al_mean
        met_ref[3] = mae_std_al_ae
        met_ref[4] = pearson


def robust_regression_eval(output, target, norm_params, tile_r=None):
    """output: [B, 2]  target: [B, 1]  norm_params: [2] = (mean, std) f32.

    Returns (pred [B,1] f32, std_al [B,1] f32,
             metrics[5] = [mae, rmse, std_al_mean, mae_std_al_ae, pearson]).
    """
    B = output.shape[0]
    mean_v = output[:, 0].astype(jnp.float32)             # chunk(2, dim=1)[0]
    logstd_v = output[:, 1].astype(jnp.float32)            # chunk(2, dim=1)[1]
    tgt_v = target[:, 0].astype(jnp.float32)

    R = int(pl.cdiv(B, 128))
    max_tile_r = 2048                    # ~1 MiB f32 per (tile_r, 128) block
    if tile_r is None:
        tile_r = max_tile_r
    tile_r = int(min(int(tile_r), max_tile_r))
    if R <= tile_r:
        tile_r = R                       # full row dim -> always legal block
    else:
        tile_r = max(8, (tile_r // 8) * 8)
    grid_r = int(pl.cdiv(R, tile_r))

    B_pad = R * 128

    def to2d(v):
        return jnp.pad(v, (0, B_pad - B)).reshape(R, 128)

    mean2 = to2d(mean_v)
    logstd2 = to2d(logstd_v)
    tgt2 = to2d(tgt_v)

    count = jnp.array([B], dtype=jnp.int32)
    norm_params = norm_params.astype(jnp.float32)

    pred2, std2, metrics = pl.pallas_call(
        _robust_reg_kernel,
        out_shape=(
            jax.ShapeDtypeStruct((R, 128), jnp.float32),
            jax.ShapeDtypeStruct((R, 128), jnp.float32),
            jax.ShapeDtypeStruct((5,), jnp.float32),
        ),
        grid_spec=pltpu.PrefetchScalarGridSpec(
            num_scalar_prefetch=2,
            grid=(grid_r,),
            in_specs=[
                pl.BlockSpec((tile_r, 128), lambda i, norm, cnt: (i, 0)),
                pl.BlockSpec((tile_r, 128), lambda i, norm, cnt: (i, 0)),
                pl.BlockSpec((tile_r, 128), lambda i, norm, cnt: (i, 0)),
            ],
            out_specs=(
                pl.BlockSpec((tile_r, 128), lambda i, norm, cnt: (i, 0)),
                pl.BlockSpec((tile_r, 128), lambda i, norm, cnt: (i, 0)),
                pl.BlockSpec(memory_space=pltpu.MemorySpace.SMEM),
            ),
            scratch_shapes=[pltpu.VMEM((6, tile_r, 128), jnp.float32)],
        ),
        compiler_params=pltpu.CompilerParams(
            dimension_semantics=("arbitrary",),   # sequential accumulation
            vmem_limit_bytes=40 * 1024 * 1024),
    )(norm_params, count, mean2, logstd2, tgt2)

    pred = pred2.reshape(-1)[:B].reshape(B, 1)
    std_al = std2.reshape(-1)[:B].reshape(B, 1)
    return pred, std_al, metrics


# ----------------------------------------------------------------------------
# Pure-JAX references
# ----------------------------------------------------------------------------
def _softmax_ref(x):
    return jax.nn.softmax(x.astype(jnp.float32), axis=1).astype(x.dtype)


def _robust_reg_ref(output, target, norm_params):
    n_mean, n_std = norm_params[0], norm_params[1]
    mean_col = output[:, 0:1].astype(jnp.float32)
    log_std = output[:, 1:2].astype(jnp.float32)
    tgt = target.astype(jnp.float32)
    pred = mean_col * n_std + n_mean
    std_al = n_std * jnp.exp(log_std)
    ae = jnp.abs(tgt - pred)
    mae = jnp.mean(ae)
    rmse = jnp.sqrt(jnp.mean((pred - tgt) ** 2))
    std_al_mean = jnp.mean(std_al)
    mae_std_al_ae = jnp.mean(jnp.abs(std_al - ae))
    dx = std_al - std_al_mean
    dy = ae - mae
    pearson = jnp.sum(dx * dy) / (
        jnp.sqrt(jnp.sum(dx * dx)) * jnp.sqrt(jnp.sum(dy * dy)) + 1e-12)
    metrics = jnp.stack([mae, rmse, std_al_mean, mae_std_al_ae, pearson])
    return pred, std_al, metrics


if __name__ == "__main__":
    key = jax.random.PRNGKey(0)
    k1, k2, k3, k4, k5, k6, k7 = jax.random.split(key, 7)

    # ---- classification path: BaseModel(task='classification', robust=False)
    B_cls, n_classes = 16, 32
    cls_output = jax.random.normal(k1, (B_cls, n_classes), dtype=jnp.float32)
    logits = softmax_dim1(cls_output)
    jax.block_until_ready(logits)
    assert logits.shape == (B_cls, n_classes)
    assert jnp.allclose(logits, _softmax_ref(cls_output), atol=2e-3, rtol=2e-3)

    # ragged batch / class count (full-dim block path, masked lane stores)
    ragged = jax.random.normal(k4, (13, 10), dtype=jnp.float32)
    logits_r = softmax_dim1(ragged)
    jax.block_until_ready(logits_r)
    assert jnp.allclose(logits_r, _softmax_ref(ragged), atol=2e-3, rtol=2e-3)

    # multi-tile grid with a ragged (partial) last block and C % 128 != 0
    big = jax.random.normal(k5, (300, 160), dtype=jnp.float32)
    logits_b = softmax_dim1(big, tile_b=128)
    jax.block_until_ready(logits_b)
    assert jnp.allclose(logits_b, _softmax_ref(big), atol=2e-3, rtol=2e-3)

    # ---- regression path: BaseModel(task='regression', robust=True, n_targets=1)
    B_reg = 16
    reg_output = jax.random.normal(k2, (B_reg, 2), dtype=jnp.float32)
    target = jax.random.normal(k3, (B_reg, 1), dtype=jnp.float32) * 2.0 + 1.0
    norm_params = jnp.array([0.5, 1.5], dtype=jnp.float32)  # (mean, std)

    pred, std_al, metrics = robust_regression_eval(reg_output, target, norm_params)
    jax.block_until_ready((pred, std_al, metrics))

    pred_r, std_r, met_r = _robust_reg_ref(reg_output, target, norm_params)
    assert jnp.allclose(pred, pred_r, atol=1e-5, rtol=1e-5)
    assert jnp.allclose(std_al, std_r, atol=1e-5, rtol=1e-5)
    assert jnp.allclose(metrics, met_r, atol=1e-4, rtol=1e-4)

    # larger batch exercising the multi-tile grid + partial-block masking
    B2 = 2600
    reg_out2 = jax.random.normal(k6, (B2, 2), dtype=jnp.float32)
    target2 = jax.random.normal(k7, (B2, 1), dtype=jnp.float32) * 2.0 + 1.0
    pred2, std2, met2 = robust_regression_eval(reg_out2, target2, norm_params,
                                               tile_r=8)
    jax.block_until_ready((pred2, std2, met2))
    pred2_r, std2_r, met2_r = _robust_reg_ref(reg_out2, target2, norm_params)
    assert jnp.allclose(pred2, pred2_r, atol=1e-5, rtol=1e-5)
    assert jnp.allclose(std2, std2_r, atol=1e-5, rtol=1e-5)
    assert jnp.allclose(met2, met2_r, atol=5e-4, rtol=5e-4)

    print("KERNEL_OK")
</pallas_src>

<mosaic_0001>
module attributes {stable_mosaic.version = 11 : i64} {
  func.func @_softmax_kernel(%arg0: i32, %arg1: memref<16x32xf32, #tpu.memory_space<vmem>>, %arg2: memref<16x32xf32, #tpu.memory_space<vmem>>) attributes {dimension_semantics = [#tpu.dimension_semantics<parallel>], iteration_bounds = array<i64: 1>, scalar_prefetch = 0 : i64, scratch_operands = 0 : i64, tpu.core_type = #tpu.core_type<tc>, window_params = [{transform_indices = @transform_0, window_bounds = array<i64: 16, 32>}, {transform_indices = @transform_1, window_bounds = array<i64: 16, 32>}]} {
    %c0 = arith.constant 0 : index
    %c0_0 = arith.constant 0 : index
    %0 = vector.load %arg1[%c0, %c0_0] : memref<16x32xf32, #tpu.memory_space<vmem>>, vector<16x32xf32>
    %cst = arith.constant dense<0xFF800000> : vector<16xf32>
    %1 = vector.multi_reduction <maximumf>, %0, %cst [1] : vector<16x32xf32> to vector<16xf32>
    %2 = vector.shape_cast %1 : vector<16xf32> to vector<16x1xf32>
    %3 = vector.broadcast %2 : vector<16x1xf32> to vector<16x32xf32>
    %4 = arith.subf %0, %3 : vector<16x32xf32>
    %5 = math.exp %4 : vector<16x32xf32>
    %cst_1 = arith.constant dense<0.000000e+00> : vector<16xf32>
    %6 = vector.multi_reduction <add>, %5, %cst_1 [1] : vector<16x32xf32> to vector<16xf32>
    %7 = vector.shape_cast %6 : vector<16xf32> to vector<16x1xf32>
    %8 = tpu.reciprocal %7 {approx = true} : vector<16x1xf32> -> vector<16x1xf32>
    %9 = vector.broadcast %8 : vector<16x1xf32> to vector<16x32xf32>
    %10 = arith.mulf %5, %9 : vector<16x32xf32>
    %c0_2 = arith.constant 0 : index
    %c0_3 = arith.constant 0 : index
    %11 = vector.load %arg2[%c0_2, %c0_3] : memref<16x32xf32, #tpu.memory_space<vmem>>, vector<16x32xf32>
    tpu.vector_store %arg2[%c0_2, %c0_3], %10 {strides = array<i32>} : memref<16x32xf32, #tpu.memory_space<vmem>>, vector<16x32xf32>,
    return
  }
  func.func @transform_0(%arg0: i32) -> (i32, i32) {
    %c0_i32 = arith.constant 0 : i32
    %c0_i32_0 = arith.constant 0 : i32
    return %arg0, %c0_i32 : i32, i32
  }
  func.func @transform_1(%arg0: i32) -> (i32, i32) {
    %c0_i32 = arith.constant 0 : i32
    %c0_i32_0 = arith.constant 0 : i32
    return %arg0, %c0_i32 : i32, i32
  }
}

</mosaic_0001>

<bundles_post_ra>
// kernel: tpu_custom_call.1
= control target key start
LH: loop header
LB: loop body
LE: loop exit
PB: predicated region body
PF: predicated region fallthrough
CT: control target
= control target key end

     0   :  { %6 = vsyncpa [#allocation3], 0  ;;  %s155_s0 = inlined_call_operand.hbm [shape: f32[16,32], index: 0, kind: input, shape index: {}]   ;;  %s156_s1 = inlined_call_operand.hbm [shape: f32[16,32], index: 1, kind: output, shape index: {}]  }
   0x1   :  { %7 = vsyncpa [#allocation4], 0  ;;  %s123_s6 = smov [#allocation2]  }
   0x2   :  { %s13_s7 = sshll.u32 %s123_s6, 4  ;;  %s14_s7 = int_to_ptr.vmem [resolvable:$true] %s13_s7 }
   0x3   :  { %s87_s8 = scalar_lea.vmem %s14_s7, 256  ;;  %p92_p1 = scmp.lt.s32.totalorder %s14_s7, %s14_s7 }
   0x4   :  { %p88_p0 = scmp.ne.s32.totalorder %s14_s7, %s87_s8  ;;  %p93_p2 = scmp.lt.s32.totalorder %s87_s8, %s87_s8 }
   0x6   :  { %p94_p3 = por %p93_p2, %p92_p1 }
   0x8   :  { %p95_p4 = pnand %p94_p3, %p88_p0 }
   0xa   :  { %98 = shalt.err (!%p95_p4)
}
   0xb   :  { %s124_s9 = smov 128   ;;  %s125_s10 = smov 8  }
   0xc   :  { %19 = dma.hbm_to_vmem [thread:$0]  %s155_s0, 256, %s14_s7, [#allocation3], %s124_s9, %s124_s9, %s125_s10  }
   0xd   :  { %119 = dma.done.wait [#allocation3], 256  }
   0xe   :  { %120 = vsyncadd [#allocation3], 4294967040  ;;  %vm25_vm0 = vcmask 261120   ;;  %v23_v0 = vld [vmem:[#allocation2] sm:$0xff]  ;;  %v24_v1 = vld [vmem:[#allocation2 + $0x8] sm:$0xff]  ;;  %s126_s0 = smov [#allocation5]  }
   0xf   :  { %v26_v2 = vsel %vm25_vm0, %v23_v0, -inf  ;;  %v29_v3 = vsel %vm25_vm0, %v24_v1, -inf  ;;  %s55_s13 = sshll.u32 %s126_s0, 4  ;;  %s56_s13 = int_to_ptr.vmem [resolvable:$true] %s55_s13 }
  0x10   :  { %27 = vmax.xlane.f32.xlu0 %v26_v2  ;;  %s99_s14 = scalar_lea.vmem %s56_s13, 256  ;;  %p104_p6 = scmp.lt.s32.totalorder %s56_s13, %s56_s13 }
  0x11   :  { %p100_p5 = scmp.ne.s32.totalorder %s56_s13, %s99_s14  ;;  %p105_p7 = scmp.lt.s32.totalorder %s99_s14, %s99_s14 }
  0x13   :  { %p106_p8 = por %p105_p7, %p104_p6 }
  0x14   :  { %30 = vmax.xlane.f32.xlu0 %v29_v3 }
  0x15   :  { %p107_p9 = pnand %p106_p8, %p100_p5 }
  0x99   :  { %v28_v4 = vpop.xlane.xlu0 %27 }
  0x9a   :  { %v32_v5 = vsub.f32 %v23_v0, %v28_v4 }
  0x9c   :  { %v34_v6 = vmul.f32 1.442695, %v32_v5 }
  0x9d   :  { %v31_v7 = vpop.xlane.xlu0 %30 }
  0x9e   :  { %71 = vpow2.f32 %v34_v6  ;;  %v33_v8 = vsub.f32 %v24_v1, %v31_v7 }
  0xa0   :  { %v36_v9 = vmul.f32 1.442695, %v33_v8 }
  0xa2   :  { %73 = vpow2.f32 %v36_v9 }
  0xab   :  { %v72_v10 = vpop.eup %71 }
  0xac   :  { %v38_v11 = vsel %vm25_vm0, %v72_v10, 0.0 }
  0xad   :  { %39 = vadd.xlane.f32.xlu1 %v38_v11 }
  0xaf   :  { %v74_v12 = vpop.eup %73 }
  0xb0   :  { %v41_v13 = vsel %vm25_vm0, %v74_v12, 0.0 }
  0xb1   :  { %42 = vadd.xlane.f32.xlu1 %v41_v13 }
 0x136   :  { %v40_v14 = vpop.xlane.xlu1 %39 }
 0x137   :  { %75 = vrcp.f32 %v40_v14 }
 0x13a   :  { %v43_v15 = vpop.xlane.xlu1 %42 }
 0x13b   :  { %77 = vrcp.f32 %v43_v15 }
 0x144   :  { %v76_v16 = vpop.eup %75 }
 0x145   :  { %v46_v17 = vmul.f32 %v76_v16, %v72_v10 }
 0x147   :  { %48 = vst.msk [vmem:[#allocation5] sm:$0xff] %vm25_vm0, %v46_v17 }
 0x148   :  { %v78_v18 = vpop.eup %77 }
 0x149   :  { %v47_v19 = vmul.f32 %v78_v18, %v74_v12 }
 0x14b   :  { %49 = vst.msk [vmem:[#allocation5 + $0x8] sm:$0xff] %vm25_vm0, %v47_v19 }
 0x14c   :  { %110 = shalt.err (!%p107_p9)
}
 0x14d   :  { %61 = dma.vmem_to_hbm [thread:$0]  %s56_s13, 256, %s156_s1, [#allocation4], %s124_s9, %s124_s9, %s125_s10  }
 0x14e   :  { %121 = dma.done.wait [#allocation4], 256  }
 0x14f   :  { %122 = vsyncadd [#allocation4], 4294967040 }
 0x150   :  { %65 = vsyncpa [#allocation3], 1 }
 0x151   :  { %66 = vsyncpa [#allocation4], 1 }

</bundles_post_ra>
